<compile_context>
chip_gen: v5e
topology: v5e:2x2
jax: 0.10.0
libtpu: 0.0.40
codegen_flags: <defaults>
</compile_context>

<pallas_src>
import jax
import jax.numpy as jnp
from jax.experimental import pallas as pl
from jax.experimental.pallas import tpu as pltpu


def _pick_tile(total, target, quanta):
    """Largest divisor of `total` that is <= target and a multiple of one of
    `quanta` (tried in order); falls back to the full dim (always legal)."""
    if total <= target:
        return total
    for q in quanta:
        t = (target // q) * q
        while t >= q:
            if total % t == 0:
                return t
            t -= q
    return total


def _hw_budget():
    """Generation-aware (vmem_limit, tm_target, tn_target, tn_quanta, multicore)."""
    try:
        vmem_cap = int(pltpu.get_tpu_info().vmem_capacity_bytes)
    except Exception:
        vmem_cap = 128 * 1024 * 1024
    try:
        kind = jax.devices()[0].device_kind.lower()
    except Exception:
        kind = ""
    is_v7 = ("v7" in kind) or (vmem_cap <= 80 * 1024 * 1024)
    is_v5 = "v5" in kind
    cap = 56 * 2**20 if is_v7 else 100 * 2**20
    vmem_limit = max(32 * 2**20, min(int(vmem_cap * 0.75), cap))
    if is_v7:
        # 3.2 TB/s HBM -> tm ~512 already compute-bound; 64 MiB VMEM is tight.
        return vmem_limit, 512, 512, (256, 128), True
    if is_v5:
        # lowest HBM BW; fewer row tiles still cut W_lm re-reads.
        return vmem_limit, 1024, 512, (128,), False
    # v6e-like default: 128 MiB VMEM, 256-wide MXU.
    return vmem_limit, 1024, 1024, (256, 128), False


def vtrace_kernel(x_ref, mask_ref, wh_ref, bh_ref, wlm_ref, blm_ref,
                  wv_ref, bv_ref,
                  logits_ref, values_ref, hidden_ref,
                  h_sc):
    # NOTE: the h_sc reuse below is only correct because j (lm-head columns)
    # is the innermost, sequentially executed "arbitrary" grid axis for a
    # fixed row tile i.  Do not reorder the grid or mark j "parallel".
    j = pl.program_id(1)

    # --- synthetic base model + value head: once per row tile --------------
    @pl.when(j == 0)
    def _():
        h = jnp.tanh(
            jnp.dot(x_ref[...], wh_ref[...],
                    preferred_element_type=jnp.float32)
            + bh_ref[...]
        )
        h = h * mask_ref[...]                       # zero padded positions
        hidden_ref[...] = h.astype(hidden_ref.dtype)   # outputs.last_hidden_state
        # value head nn.Linear(H, 1) as a VPU/XLU row reduction; stored
        # lane-dense as a (1, tm) row.
        v = jnp.sum(h * wv_ref[...], axis=-1)       # (tm,)
        values_ref[...] = (v[None, :] + bv_ref[...]).astype(values_ref.dtype)
        # keep bf16 copy of h resident for all V tiles of the lm head
        h_sc[...] = h.astype(jnp.bfloat16)

    # --- lm head: one (tm, tn) logits tile per grid step --------------------
    logits_ref[...] = (
        jnp.dot(h_sc[...], wlm_ref[...], preferred_element_type=jnp.float32)
        + blm_ref[...]
    ).astype(logits_ref.dtype)


def vtrace_forward(input_ids, attention_mask, params, out_dtype=jnp.float32):
    B, S = input_ids.shape
    H = params["W_embed"].shape[1]
    V = params["W_lm"].shape[1]
    N = B * S

    if attention_mask is None:
        attention_mask = jnp.ones((B, S), dtype=jnp.int32)

    vmem_limit, tm_target, tn_target, tn_quanta, multi_core = _hw_budget()

    # Row tile quantum: 256 (MXU rows) preferred, 16 (bf16 sublane packing)
    # then 8 as fallbacks.
    tm = _pick_tile(N, tm_target, (256, 16, 8))
    tn = _pick_tile(V, tn_target, tn_quanta)

    # v7x: the "parallel" row axis shards across the two TensorCores; make
    # sure there are at least 2 row tiles.
    if multi_core and N // tm < 2:
        tm2 = _pick_tile(N, max(N // 2, 8), (256, 16, 8))
        if 0 < tm2 < tm and N // tm2 >= 2:
            tm = tm2

    out_isz = jnp.dtype(out_dtype).itemsize

    def _fits(tm_, tn_):
        need = (
            2 * tm_ * H * 2 + 2 * tm_ * 4          # x, mask (double-buffered)
            + H * H * 2 + H * 4                    # W_h, b_h (single-buffered)
            + H * 4 + 4                            # w_v, b_v
            + 2 * (H * tn_ * 2 + tn_ * 4)          # W_lm, b_lm (double-buffered)
            + 2 * tm_ * tn_ * out_isz              # logits out
            + 2 * tm_ * 4                          # values out
            + 2 * tm_ * H * out_isz                # hidden out
            + tm_ * H * 2                          # h_sc scratch
        )
        return need <= int(vmem_limit * 0.85)

    # Shrink tn first (re-streaming more W_lm column tiles is cheaper than
    # losing row-tile arithmetic intensity), then tm.
    while not _fits(tm, tn) and tn > 128:
        nt = _pick_tile(V, max(tn // 2, 128), tn_quanta)
        if nt >= tn:
            break
        tn = nt
    while not _fits(tm, tn) and tm > 8:
        nt = _pick_tile(N, max(tm // 2, 8), (256, 16, 8))
        if nt >= tm:
            break
        tm = nt

    x = params["W_embed"][input_ids].reshape(N, H).astype(jnp.bfloat16)
    mask = attention_mask.reshape(N, 1).astype(jnp.float32)

    w_h = params["W_h"].astype(jnp.bfloat16)
    b_h = params["b_h"].astype(jnp.float32)
    w_lm = params["W_lm"].astype(jnp.bfloat16)
    b_lm = params["b_lm"].astype(jnp.float32)
    wv_row = params["w_v"].reshape(1, H).astype(jnp.float32)
    b_v = params["b_v"].astype(jnp.float32)

    n_row_tiles = N // tm
    grid = (n_row_tiles, V // tn)

    cost = pl.CostEstimate(
        flops=2 * N * H * (H + V) + 2 * N * H,
        transcendentals=N * H,
        bytes_accessed=(
            N * H * 2 + N * 4                        # x, mask
            + H * H * 2 + H * 4                      # W_h, b_h (resident)
            + n_row_tiles * (H * V * 2 + V * 4)      # W_lm, b_lm per row tile
            + N * V * out_isz + N * H * out_isz      # logits, hidden
            + N * 4                                  # values
        ),
    )

    out_shapes = (
        jax.ShapeDtypeStruct((N, V), out_dtype),     # logits
        jax.ShapeDtypeStruct((1, N), jnp.float32),   # values (lane-dense)
        jax.ShapeDtypeStruct((N, H), out_dtype),     # hidden_states
    )

    def _resident(shape, use_buffered):
        # Constant block index -> single VMEM buffer (no double-buffering).
        if use_buffered:
            return pl.BlockSpec(shape, lambda i, j: (0, 0),
                                pipeline_mode=pl.Buffered(1))
        return pl.BlockSpec(shape, lambda i, j: (0, 0))

    def _run(use_buffered):
        res = pl.pallas_call(
            vtrace_kernel,
            out_shape=out_shapes,
            grid=grid,
            in_specs=[
                pl.BlockSpec((tm, H), lambda i, j: (i, 0)),    # x
                pl.BlockSpec((tm, 1), lambda i, j: (i, 0)),    # mask
                _resident((H, H), use_buffered),               # W_h
                _resident((1, H), use_buffered),               # b_h
                pl.BlockSpec((H, tn), lambda i, j: (0, j)),    # W_lm tile
                pl.BlockSpec((1, tn), lambda i, j: (0, j)),    # b_lm tile
                _resident((1, H), use_buffered),               # w_v (row)
                _resident((1, 1), use_buffered),               # b_v
            ],
            out_specs=(
                pl.BlockSpec((tm, tn), lambda i, j: (i, j)),   # logits
                pl.BlockSpec((1, tm),  lambda i, j: (0, i)),   # values
                pl.BlockSpec((tm, H),  lambda i, j: (i, 0)),   # hidden
            ),
            scratch_shapes=[pltpu.VMEM((tm, H), jnp.bfloat16)],
            compiler_params=pltpu.CompilerParams(
                dimension_semantics=("parallel", "arbitrary"),
                vmem_limit_bytes=vmem_limit,
            ),
            cost_estimate=cost,
        )(x, mask, w_h, b_h, w_lm, b_lm, wv_row, b_v)
        return jax.block_until_ready(res)

    try:
        logits, values, hidden = _run(True)
    except Exception:
        # pipeline_mode=pl.Buffered(1) unavailable/rejected on this jax/libtpu;
        # fall back to default double-buffering (correctness unchanged).
        logits, values, hidden = _run(False)

    return {
        "logits": logits.reshape(B, S, V),
        "values": values.reshape(B, S, 1),          # (1, N) -> (B, S, 1)
        "hidden_states": hidden.reshape(B, S, H),
    }


def vtrace_reference(input_ids, attention_mask, params):
    """Plain-JAX f32 reference for correctness checking."""
    x = params["W_embed"][input_ids].astype(jnp.float32)
    mask = attention_mask[..., None].astype(jnp.float32)
    h = jnp.tanh(x @ params["W_h"] + params["b_h"]) * mask
    logits = h @ params["W_lm"] + params["b_lm"]
    values = h @ params["w_v"] + params["b_v"]
    return {"logits": logits, "values": values, "hidden_states": h}


def init_params(key, vocab_size, hidden_size):
    ks = jax.random.split(key, 6)
    scale = 0.02
    return {
        "W_embed": scale * jax.random.normal(ks[0], (vocab_size, hidden_size), jnp.float32),
        "W_h":     scale * jax.random.normal(ks[1], (hidden_size, hidden_size), jnp.float32),
        "b_h":     jnp.zeros((1, hidden_size), jnp.float32),
        "W_lm":    scale * jax.random.normal(ks[2], (hidden_size, vocab_size), jnp.float32),
        "b_lm":    jnp.zeros((1, vocab_size), jnp.float32),
        # value_head = nn.Linear(hidden_size, 1)
        "w_v":     scale * jax.random.normal(ks[3], (hidden_size, 1), jnp.float32),
        "b_v":     jnp.zeros((1, 1), jnp.float32),
    }


if __name__ == "__main__":
    B, S, H, V = 2, 8, 32, 128

    key = jax.random.PRNGKey(0)
    pkey, ikey = jax.random.split(key)
    params = init_params(pkey, vocab_size=V, hidden_size=H)

    input_ids = jax.random.randint(ikey, (B, S), 0, V, dtype=jnp.int32)
    attention_mask = jnp.ones((B, S), dtype=jnp.int32)

    ref = vtrace_reference(input_ids, attention_mask, params)

    # f32 writeback (matches the PyTorch module's output dtype).
    out = vtrace_forward(input_ids, attention_mask, params)
    jax.block_until_ready(out)

    assert out["logits"].shape == (B, S, V)
    assert out["values"].shape == (B, S, 1)
    assert out["hidden_states"].shape == (B, S, H)
    assert jnp.allclose(out["logits"], ref["logits"], atol=1e-2, rtol=1e-2)
    assert jnp.allclose(out["values"], ref["values"], atol=1e-2, rtol=1e-2)
    assert jnp.allclose(out["hidden_states"], ref["hidden_states"], atol=1e-2, rtol=1e-2)
    assert bool(jnp.all(jnp.isfinite(out["logits"])))

    # bf16 writeback path (halves logits/hidden HBM writes; per-review win on
    # v5e / v7x) -- f32 accumulation, cast at store.
    out_bf16 = vtrace_forward(input_ids, attention_mask, params,
                              out_dtype=jnp.bfloat16)
    jax.block_until_ready(out_bf16)
    assert out_bf16["logits"].dtype == jnp.bfloat16
    assert jnp.allclose(out_bf16["logits"].astype(jnp.float32),
                        ref["logits"], atol=3e-2, rtol=3e-2)
    assert jnp.allclose(out_bf16["hidden_states"].astype(jnp.float32),
                        ref["hidden_states"], atol=3e-2, rtol=3e-2)
    assert jnp.allclose(out_bf16["values"], ref["values"], atol=1e-2, rtol=1e-2)

    print("KERNEL_OK")
</pallas_src>

<mosaic_0001>
module attributes {stable_mosaic.version = 11 : i64} {
  func.func @vtrace_kernel(%arg0: i32, %arg1: i32, %arg2: memref<16x32xbf16, #tpu.memory_space<vmem>>, %arg3: memref<16x1xf32, #tpu.memory_space<vmem>>, %arg4: memref<32x32xbf16, #tpu.memory_space<vmem>>, %arg5: memref<1x32xf32, #tpu.memory_space<vmem>>, %arg6: memref<32x128xbf16, #tpu.memory_space<vmem>>, %arg7: memref<1x128xf32, #tpu.memory_space<vmem>>, %arg8: memref<1x32xf32, #tpu.memory_space<vmem>>, %arg9: memref<1x1xf32, #tpu.memory_space<vmem>>, %arg10: memref<16x128xf32, #tpu.memory_space<vmem>>, %arg11: memref<1x16xf32, #tpu.memory_space<vmem>>, %arg12: memref<16x32xf32, #tpu.memory_space<vmem>>, %arg13: memref<16x32xbf16, #tpu.memory_space<vmem>>) attributes {dimension_semantics = [#tpu.dimension_semantics<parallel>, #tpu.dimension_semantics<arbitrary>], iteration_bounds = array<i64: 1, 1>, scalar_prefetch = 0 : i64, scratch_operands = 1 : i64, tpu.core_type = #tpu.core_type<tc>, window_params = [{transform_indices = @transform_0, window_bounds = array<i64: 16, 32>}, {transform_indices = @transform_1, window_bounds = array<i64: 16, 1>}, {pipeline_mode = #tpu.pipeline_mode<synchronous>, transform_indices = @transform_2, window_bounds = array<i64: 32, 32>}, {pipeline_mode = #tpu.pipeline_mode<synchronous>, transform_indices = @transform_3, window_bounds = array<i64: 1, 32>}, {transform_indices = @transform_4, window_bounds = array<i64: 32, 128>}, {transform_indices = @transform_5, window_bounds = array<i64: 1, 128>}, {pipeline_mode = #tpu.pipeline_mode<synchronous>, transform_indices = @transform_6, window_bounds = array<i64: 1, 32>}, {pipeline_mode = #tpu.pipeline_mode<synchronous>, transform_indices = @transform_7, window_bounds = array<i64: 1, 1>}, {transform_indices = @transform_8, window_bounds = array<i64: 16, 128>}, {transform_indices = @transform_9, window_bounds = array<i64: 1, 16>}, {transform_indices = @transform_10, window_bounds = array<i64: 16, 32>}]} {
    %c0_i32 = arith.constant 0 : i32
    %0 = arith.cmpi eq, %arg1, %c0_i32 : i32
    %1 = arith.extui %0 : i1 to i32
    %c0_i32_0 = arith.constant 0 : i32
    %2 = arith.cmpi ne, %1, %c0_i32_0 : i32
    scf.if %2 {
      %c0_8 = arith.constant 0 : index
      %c0_9 = arith.constant 0 : index
      %10 = vector.load %arg2[%c0_8, %c0_9] : memref<16x32xbf16, #tpu.memory_space<vmem>>, vector<16x32xbf16>
      %c0_10 = arith.constant 0 : index
      %c0_11 = arith.constant 0 : index
      %11 = vector.load %arg4[%c0_10, %c0_11] : memref<32x32xbf16, #tpu.memory_space<vmem>>, vector<32x32xbf16>
      %cst_12 = arith.constant dense<0.000000e+00> : vector<16x32xf32>
      %12 = tpu.matmul %10, %11, %cst_12 {dimension_numbers = #tpu.dot_dimension_numbers<[1], [0], [0], [1], [0, 0, 1, 1], [], []>} : vector<16x32xbf16>, vector<32x32xbf16>, vector<16x32xf32> -> vector<16x32xf32>
      %c0_13 = arith.constant 0 : index
      %c0_14 = arith.constant 0 : index
      %13 = vector.load %arg5[%c0_13, %c0_14] : memref<1x32xf32, #tpu.memory_space<vmem>>, vector<1x32xf32>
      %14 = vector.broadcast %13 : vector<1x32xf32> to vector<16x32xf32>
      %15 = arith.addf %12, %14 : vector<16x32xf32>
      %16 = math.tanh %15 : vector<16x32xf32>
      %c0_15 = arith.constant 0 : index
      %c0_16 = arith.constant 0 : index
      %17 = vector.load %arg3[%c0_15, %c0_16] : memref<16x1xf32, #tpu.memory_space<vmem>>, vector<16x1xf32>
      %18 = vector.broadcast %17 : vector<16x1xf32> to vector<16x32xf32>
      %19 = arith.mulf %16, %18 : vector<16x32xf32>
      %c0_17 = arith.constant 0 : index
      %c0_18 = arith.constant 0 : index
      %20 = vector.load %arg12[%c0_17, %c0_18] : memref<16x32xf32, #tpu.memory_space<vmem>>, vector<16x32xf32>
      tpu.vector_store %arg12[%c0_17, %c0_18], %19 {strides = array<i32>} : memref<16x32xf32, #tpu.memory_space<vmem>>, vector<16x32xf32>,
      %c0_19 = arith.constant 0 : index
      %c0_20 = arith.constant 0 : index
      %21 = vector.load %arg8[%c0_19, %c0_20] : memref<1x32xf32, #tpu.memory_space<vmem>>, vector<1x32xf32>
      %22 = vector.broadcast %21 : vector<1x32xf32> to vector<16x32xf32>
      %23 = arith.mulf %19, %22 : vector<16x32xf32>
      %cst_21 = arith.constant dense<0.000000e+00> : vector<16xf32>
      %24 = vector.multi_reduction <add>, %23, %cst_21 [1] : vector<16x32xf32> to vector<16xf32>
      %25 = vector.shape_cast %24 : vector<16xf32> to vector<1x16xf32>
      %c0_22 = arith.constant 0 : index
      %c0_23 = arith.constant 0 : index
      %26 = vector.load %arg9[%c0_22, %c0_23] : memref<1x1xf32, #tpu.memory_space<vmem>>, vector<1x1xf32>
      %27 = vector.broadcast %26 : vector<1x1xf32> to vector<1x16xf32>
      %28 = arith.addf %25, %27 : vector<1x16xf32>
      %c0_24 = arith.constant 0 : index
      %c0_25 = arith.constant 0 : index
      %29 = vector.load %arg11[%c0_24, %c0_25] : memref<1x16xf32, #tpu.memory_space<vmem>>, vector<1x16xf32>
      tpu.vector_store %arg11[%c0_24, %c0_25], %28 {strides = array<i32>} : memref<1x16xf32, #tpu.memory_space<vmem>>, vector<1x16xf32>,
      %30 = arith.truncf %19 : vector<16x32xf32> to vector<16x32xbf16>
      %c0_26 = arith.constant 0 : index
      %c0_27 = arith.constant 0 : index
      %31 = vector.load %arg13[%c0_26, %c0_27] : memref<16x32xbf16, #tpu.memory_space<vmem>>, vector<16x32xbf16>
      tpu.vector_store %arg13[%c0_26, %c0_27], %30 {strides = array<i32>} : memref<16x32xbf16, #tpu.memory_space<vmem>>, vector<16x32xbf16>,
    } else {
    }
    %c0 = arith.constant 0 : index
    %c0_1 = arith.constant 0 : index
    %3 = vector.load %arg13[%c0, %c0_1] : memref<16x32xbf16, #tpu.memory_space<vmem>>, vector<16x32xbf16>
    %c0_2 = arith.constant 0 : index
    %c0_3 = arith.constant 0 : index
    %4 = vector.load %arg6[%c0_2, %c0_3] : memref<32x128xbf16, #tpu.memory_space<vmem>>, vector<32x128xbf16>
    %cst = arith.constant dense<0.000000e+00> : vector<16x128xf32>
    %5 = tpu.matmul %3, %4, %cst {dimension_numbers = #tpu.dot_dimension_numbers<[1], [0], [0], [1], [0, 0, 1, 1], [], []>} : vector<16x32xbf16>, vector<32x128xbf16>, vector<16x128xf32> -> vector<16x128xf32>
    %c0_4 = arith.constant 0 : index
    %c0_5 = arith.constant 0 : index
    %6 = vector.load %arg7[%c0_4, %c0_5] : memref<1x128xf32, #tpu.memory_space<vmem>>, vector<1x128xf32>
    %7 = vector.broadcast %6 : vector<1x128xf32> to vector<16x128xf32>
    %8 = arith.addf %5, %7 : vector<16x128xf32>
    %c0_6 = arith.constant 0 : index
    %c0_7 = arith.constant 0 : index
    %9 = vector.load %arg10[%c0_6, %c0_7] : memref<16x128xf32, #tpu.memory_space<vmem>>, vector<16x128xf32>
    tpu.vector_store %arg10[%c0_6, %c0_7], %8 {strides = array<i32>} : memref<16x128xf32, #tpu.memory_space<vmem>>, vector<16x128xf32>,
    return
  }
  func.func @transform_0(%arg0: i32, %arg1: i32) -> (i32, i32) {
    %c0_i32 = arith.constant 0 : i32
    %c0_i32_0 = arith.constant 0 : i32
    return %arg0, %c0_i32 : i32, i32
  }
  func.func @transform_1(%arg0: i32, %arg1: i32) -> (i32, i32) {
    %c0_i32 = arith.constant 0 : i32
    %c0_i32_0 = arith.constant 0 : i32
    return %arg0, %c0_i32 : i32, i32
  }
  func.func @transform_2(%arg0: i32, %arg1: i32) -> (i32, i32) {
    %c0_i32 = arith.constant 0 : i32
    %c0_i32_0 = arith.constant 0 : i32
    %c0_i32_1 = arith.constant 0 : i32
    return %c0_i32, %c0_i32_0 : i32, i32
  }
  func.func @transform_3(%arg0: i32, %arg1: i32) -> (i32, i32) {
    %c0_i32 = arith.constant 0 : i32
    %c0_i32_0 = arith.constant 0 : i32
    %c0_i32_1 = arith.constant 0 : i32
    return %c0_i32, %c0_i32_0 : i32, i32
  }
  func.func @transform_4(%arg0: i32, %arg1: i32) -> (i32, i32) {
    %c0_i32 = arith.constant 0 : i32
    %c0_i32_0 = arith.constant 0 : i32
    return %c0_i32, %arg1 : i32, i32
  }
  func.func @transform_5(%arg0: i32, %arg1: i32) -> (i32, i32) {
    %c0_i32 = arith.constant 0 : i32
    %c0_i32_0 = arith.constant 0 : i32
    return %c0_i32, %arg1 : i32, i32
  }
  func.func @transform_6(%arg0: i32, %arg1: i32) -> (i32, i32) {
    %c0_i32 = arith.constant 0 : i32
    %c0_i32_0 = arith.constant 0 : i32
    %c0_i32_1 = arith.constant 0 : i32
    return %c0_i32, %c0_i32_0 : i32, i32
  }
  func.func @transform_7(%arg0: i32, %arg1: i32) -> (i32, i32) {
    %c0_i32 = arith.constant 0 : i32
    %c0_i32_0 = arith.constant 0 : i32
    %c0_i32_1 = arith.constant 0 : i32
    return %c0_i32, %c0_i32_0 : i32, i32
  }
  func.func @transform_8(%arg0: i32, %arg1: i32) -> (i32, i32) {
    %c0_i32 = arith.constant 0 : i32
    return %arg0, %arg1 : i32, i32
  }
  func.func @transform_9(%arg0: i32, %arg1: i32) -> (i32, i32) {
    %c0_i32 = arith.constant 0 : i32
    %c0_i32_0 = arith.constant 0 : i32
    return %c0_i32, %arg0 : i32, i32
  }
  func.func @transform_10(%arg0: i32, %arg1: i32) -> (i32, i32) {
    %c0_i32 = arith.constant 0 : i32
    %c0_i32_0 = arith.constant 0 : i32
    return %arg0, %c0_i32 : i32, i32
  }
}

module attributes {stable_mosaic.version = 11 : i64} {
  func.func @vtrace_kernel(%arg0: i32, %arg1: i32, %arg2: memref<16x32xbf16, #tpu.memory_space<vmem>>, %arg3: memref<16x1xf32, #tpu.memory_space<vmem>>, %arg4: memref<32x32xbf16, #tpu.memory_space<vmem>>, %arg5: memref<1x32xf32, #tpu.memory_space<vmem>>, %arg6: memref<32x128xbf16, #tpu.memory_space<vmem>>, %arg7: memref<1x128xf32, #tpu.memory_space<vmem>>, %arg8: memref<1x32xf32, #tpu.memory_space<vmem>>, %arg9: memref<1x1xf32, #tpu.memory_space<vmem>>, %arg10: memref<16x128xf32, #tpu.memory_space<vmem>>, %arg11: memref<1x16xf32, #tpu.memory_space<vmem>>, %arg12: memref<16x32xf32, #tpu.memory_space<vmem>>, %arg13: memref<16x32xbf16, #tpu.memory_space<vmem>>) attributes {dimension_semantics = [#tpu.dimension_semantics<parallel>, #tpu.dimension_semantics<arbitrary>], iteration_bounds = array<i64: 1, 1>, scalar_prefetch = 0 : i64, scratch_operands = 1 : i64, tpu.core_type = #tpu.core_type<tc>, window_params = [{transform_indices = @transform_0, window_bounds = array<i64: 16, 32>}, {transform_indices = @transform_1, window_bounds = array<i64: 16, 1>}, {pipeline_mode = #tpu.pipeline_mode<synchronous>, transform_indices = @transform_2, window_bounds = array<i64: 32, 32>}, {pipeline_mode = #tpu.pipeline_mode<synchronous>, transform_indices = @transform_3, window_bounds = array<i64: 1, 32>}, {transform_indices = @transform_4, window_bounds = array<i64: 32, 128>}, {transform_indices = @transform_5, window_bounds = array<i64: 1, 128>}, {pipeline_mode = #tpu.pipeline_mode<synchronous>, transform_indices = @transform_6, window_bounds = array<i64: 1, 32>}, {pipeline_mode = #tpu.pipeline_mode<synchronous>, transform_indices = @transform_7, window_bounds = array<i64: 1, 1>}, {transform_indices = @transform_8, window_bounds = array<i64: 16, 128>}, {transform_indices = @transform_9, window_bounds = array<i64: 1, 16>}, {transform_indices = @transform_10, window_bounds = array<i64: 16, 32>}]} {
    %c0_i32 = arith.constant 0 : i32
    %0 = arith.cmpi eq, %arg1, %c0_i32 : i32
    %1 = arith.extui %0 : i1 to i32
    %c0_i32_0 = arith.constant 0 : i32
    %2 = arith.cmpi ne, %1, %c0_i32_0 : i32
    scf.if %2 {
      %c0_8 = arith.constant 0 : index
      %c0_9 = arith.constant 0 : index
      %10 = vector.load %arg2[%c0_8, %c0_9] : memref<16x32xbf16, #tpu.memory_space<vmem>>, vector<16x32xbf16>
      %c0_10 = arith.constant 0 : index
      %c0_11 = arith.constant 0 : index
      %11 = vector.load %arg4[%c0_10, %c0_11] : memref<32x32xbf16, #tpu.memory_space<vmem>>, vector<32x32xbf16>
      %cst_12 = arith.constant dense<0.000000e+00> : vector<16x32xf32>
      %12 = tpu.matmul %10, %11, %cst_12 {dimension_numbers = #tpu.dot_dimension_numbers<[1], [0], [0], [1], [0, 0, 1, 1], [], []>} : vector<16x32xbf16>, vector<32x32xbf16>, vector<16x32xf32> -> vector<16x32xf32>
      %c0_13 = arith.constant 0 : index
      %c0_14 = arith.constant 0 : index
      %13 = vector.load %arg5[%c0_13, %c0_14] : memref<1x32xf32, #tpu.memory_space<vmem>>, vector<1x32xf32>
      %14 = vector.broadcast %13 : vector<1x32xf32> to vector<16x32xf32>
      %15 = arith.addf %12, %14 : vector<16x32xf32>
      %16 = math.tanh %15 : vector<16x32xf32>
      %c0_15 = arith.constant 0 : index
      %c0_16 = arith.constant 0 : index
      %17 = vector.load %arg3[%c0_15, %c0_16] : memref<16x1xf32, #tpu.memory_space<vmem>>, vector<16x1xf32>
      %18 = vector.broadcast %17 : vector<16x1xf32> to vector<16x32xf32>
      %19 = arith.mulf %16, %18 : vector<16x32xf32>
      %c0_17 = arith.constant 0 : index
      %c0_18 = arith.constant 0 : index
      %20 = vector.load %arg12[%c0_17, %c0_18] : memref<16x32xf32, #tpu.memory_space<vmem>>, vector<16x32xf32>
      tpu.vector_store %arg12[%c0_17, %c0_18], %19 {strides = array<i32>} : memref<16x32xf32, #tpu.memory_space<vmem>>, vector<16x32xf32>,
      %c0_19 = arith.constant 0 : index
      %c0_20 = arith.constant 0 : index
      %21 = vector.load %arg8[%c0_19, %c0_20] : memref<1x32xf32, #tpu.memory_space<vmem>>, vector<1x32xf32>
      %22 = vector.broadcast %21 : vector<1x32xf32> to vector<16x32xf32>
      %23 = arith.mulf %19, %22 : vector<16x32xf32>
      %cst_21 = arith.constant dense<0.000000e+00> : vector<16xf32>
      %24 = vector.multi_reduction <add>, %23, %cst_21 [1] : vector<16x32xf32> to vector<16xf32>
      %25 = vector.shape_cast %24 : vector<16xf32> to vector<1x16xf32>
      %c0_22 = arith.constant 0 : index
      %c0_23 = arith.constant 0 : index
      %26 = vector.load %arg9[%c0_22, %c0_23] : memref<1x1xf32, #tpu.memory_space<vmem>>, vector<1x1xf32>
      %27 = vector.broadcast %26 : vector<1x1xf32> to vector<1x16xf32>
      %28 = arith.addf %25, %27 : vector<1x16xf32>
      %c0_24 = arith.constant 0 : index
      %c0_25 = arith.constant 0 : index
      %29 = vector.load %arg11[%c0_24, %c0_25] : memref<1x16xf32, #tpu.memory_space<vmem>>, vector<1x16xf32>
      tpu.vector_store %arg11[%c0_24, %c0_25], %28 {strides = array<i32>} : memref<1x16xf32, #tpu.memory_space<vmem>>, vector<1x16xf32>,
      %30 = arith.truncf %19 : vector<16x32xf32> to vector<16x32xbf16>
      %c0_26 = arith.constant 0 : index
      %c0_27 = arith.constant 0 : index
      %31 = vector.load %arg13[%c0_26, %c0_27] : memref<16x32xbf16, #tpu.memory_space<vmem>>, vector<16x32xbf16>
      tpu.vector_store %arg13[%c0_26, %c0_27], %30 {strides = array<i32>} : memref<16x32xbf16, #tpu.memory_space<vmem>>, vector<16x32xbf16>,
    } else {
    }
    %c0 = arith.constant 0 : index
    %c0_1 = arith.constant 0 : index
    %3 = vector.load %arg13[%c0, %c0_1] : memref<16x32xbf16, #tpu.memory_space<vmem>>, vector<16x32xbf16>
    %c0_2 = arith.constant 0 : index
    %c0_3 = arith.constant 0 : index
    %4 = vector.load %arg6[%c0_2, %c0_3] : memref<32x128xbf16, #tpu.memory_space<vmem>>, vector<32x128xbf16>
    %cst = arith.constant dense<0.000000e+00> : vector<16x128xf32>
    %5 = tpu.matmul %3, %4, %cst {dimension_numbers = #tpu.dot_dimension_numbers<[1], [0], [0], [1], [0, 0, 1, 1], [], []>} : vector<16x32xbf16>, vector<32x128xbf16>, vector<16x128xf32> -> vector<16x128xf32>
    %c0_4 = arith.constant 0 : index
    %c0_5 = arith.constant 0 : index
    %6 = vector.load %arg7[%c0_4, %c0_5] : memref<1x128xf32, #tpu.memory_space<vmem>>, vector<1x128xf32>
    %7 = vector.broadcast %6 : vector<1x128xf32> to vector<16x128xf32>
    %8 = arith.addf %5, %7 : vector<16x128xf32>
    %c0_6 = arith.constant 0 : index
    %c0_7 = arith.constant 0 : index
    %9 = vector.load %arg10[%c0_6, %c0_7] : memref<16x128xf32, #tpu.memory_space<vmem>>, vector<16x128xf32>
    tpu.vector_store %arg10[%c0_6, %c0_7], %8 {strides = array<i32>} : memref<16x128xf32, #tpu.memory_space<vmem>>, vector<16x128xf32>,
    return
  }
  func.func @transform_0(%arg0: i32, %arg1: i32) -> (i32, i32) {
    %c0_i32 = arith.constant 0 : i32
    %c0_i32_0 = arith.constant 0 : i32
    return %arg0, %c0_i32 : i32, i32
  }
  func.func @transform_1(%arg0: i32, %arg1: i32) -> (i32, i32) {
    %c0_i32 = arith.constant 0 : i32
    %c0_i32_0 = arith.constant 0 : i32
    return %arg0, %c0_i32 : i32, i32
  }
  func.func @transform_2(%arg0: i32, %arg1: i32) -> (i32, i32) {
    %c0_i32 = arith.constant 0 : i32
    %c0_i32_0 = arith.constant 0 : i32
    %c0_i32_1 = arith.constant 0 : i32
    return %c0_i32, %c0_i32_0 : i32, i32
  }
  func.func @transform_3(%arg0: i32, %arg1: i32) -> (i32, i32) {
    %c0_i32 = arith.constant 0 : i32
    %c0_i32_0 = arith.constant 0 : i32
    %c0_i32_1 = arith.constant 0 : i32
    return %c0_i32, %c0_i32_0 : i32, i32
  }
  func.func @transform_4(%arg0: i32, %arg1: i32) -> (i32, i32) {
    %c0_i32 = arith.constant 0 : i32
    %c0_i32_0 = arith.constant 0 : i32
    return %c0_i32, %arg1 : i32, i32
  }
  func.func @transform_5(%arg0: i32, %arg1: i32) -> (i32, i32) {
    %c0_i32 = arith.constant 0 : i32
    %c0_i32_0 = arith.constant 0 : i32
    return %c0_i32, %arg1 : i32, i32
  }
  func.func @transform_6(%arg0: i32, %arg1: i32) -> (i32, i32) {
    %c0_i32 = arith.constant 0 : i32
    %c0_i32_0 = arith.constant 0 : i32
    %c0_i32_1 = arith.constant 0 : i32
    return %c0_i32, %c0_i32_0 : i32, i32
  }
  func.func @transform_7(%arg0: i32, %arg1: i32) -> (i32, i32) {
    %c0_i32 = arith.constant 0 : i32
    %c0_i32_0 = arith.constant 0 : i32
    %c0_i32_1 = arith.constant 0 : i32
    return %c0_i32, %c0_i32_0 : i32, i32
  }
  func.func @transform_8(%arg0: i32, %arg1: i32) -> (i32, i32) {
    %c0_i32 = arith.constant 0 : i32
    return %arg0, %arg1 : i32, i32
  }
  func.func @transform_9(%arg0: i32, %arg1: i32) -> (i32, i32) {
    %c0_i32 = arith.constant 0 : i32
    %c0_i32_0 = arith.constant 0 : i32
    return %c0_i32, %arg0 : i32, i32
  }
  func.func @transform_10(%arg0: i32, %arg1: i32) -> (i32, i32) {
    %c0_i32 = arith.constant 0 : i32
    %c0_i32_0 = arith.constant 0 : i32
    return %arg0, %c0_i32 : i32, i32
  }
}

</mosaic_0001>

<bundles_post_ra>
// kernel: tpu_custom_call.1
= control target key start
LH: loop header
LB: loop body
LE: loop exit
PB: predicated region body
PF: predicated region fallthrough
CT: control target
= control target key end

     0   :  { %s563_s0 = inlined_call_operand.hbm [shape: bf16[16,32], index: 0, kind: input, shape index: {}]   ;;  %s564_s1 = inlined_call_operand.vmem [shape: f32[16,1], index: 1, kind: input, shape index: {}]   ;;  %s565_s2 = inlined_call_operand.vmem [shape: bf16[32,32], index: 2, kind: input, shape index: {}]   ;;  %s566_s3 = inlined_call_operand.vmem [shape: f32[1,32], index: 3, kind: input, shape index: {}]   ;;  %s567_s4 = inlined_call_operand.hbm [shape: bf16[32,128], index: 4, kind: input, shape index: {}]   ;;  %s568_s5 = inlined_call_operand.vmem [shape: f32[1,128], index: 5, kind: input, shape index: {}]   ;;  %s569_s6 = inlined_call_operand.vmem [shape: f32[1,32], index: 6, kind: input, shape index: {}]   ;;  %s570_s7 = inlined_call_operand.<no memory space> [shape: f32[1,1], index: 7, kind: input, shape index: {}]   ;;  %s571_s8 = inlined_call_operand.hbm [shape: f32[16,128], index: 8, kind: output, shape index: {0}]   ;;  %s572_s9 = inlined_call_operand.hbm [shape: f32[1,16], index: 9, kind: output, shape index: {1}]   ;;  %s573_s10 = inlined_call_operand.hbm [shape: f32[16,32], index: 10, kind: output, shape index: {2}]  }
   0x1   :  { %v16_v0 = vstv %s570_s7 }
   0x2   :  { %17 = vst [vmem:[#allocation3] sm:$0x1] %v16_v0 }
   0x3   :  { %18 = vsyncpa [#allocation5], 0 }
   0x4   :  { %19 = vsyncpa [#allocation8], 0 }
   0x5   :  { %20 = vsyncpa [#allocation6], 0 }
   0x6   :  { %21 = vsyncpa [#allocation11], 0  ;;  %s26_s17 = sshll.u32 %s563_s0, 4  ;;  %s453_s18 = smov [#allocation4]   ;;  %s27_s17 = int_to_ptr.hbm [resolvable:$true] %s26_s17 }
   0x7   :  { %s28_s19 = sshll.u32 %s453_s18, 4  ;;  %s45_s22 = sshll.u32 %s567_s4, 4  ;;  %s29_s19 = int_to_ptr.vmem [resolvable:$true] %s28_s19  ;;  %s46_s22 = int_to_ptr.hbm [resolvable:$true] %s45_s22 }
   0x8   :  { %s454_s23 = smov 64   ;;  %s455_s24 = smov 4  }
   0x9   :  { %34 = dma.hbm_to_vmem [thread:$0]  %s27_s17, 128, %s29_s19, [#allocation5], %s454_s23, %s454_s23, %s455_s24  }
   0xa   :  { %s456_s7 = smov [#allocation7]  }
   0xb   :  { %s47_s25 = sshll.u32 %s456_s7, 4  ;;  %s48_s25 = int_to_ptr.vmem [resolvable:$true] %s47_s25 }
   0xc   :  { %53 = dma.hbm_to_vmem [thread:$0]  %s46_s22, 256, %s48_s25, [#allocation8], %s454_s23, %s454_s23, %s455_s24  }
   0xd   :  { %445 = dma.done.wait [#allocation5], 128  }
   0xe   :  { %446 = vsyncadd [#allocation5], 4294967168 }
   0xf   :  { %447 = dma.done.wait [#allocation8], 256  }
  0x10   :  { %448 = vsyncadd [#allocation8], 4294967040  ;;  %v457_v1 = vmov 0   ;;  %v302_v2 = vld [vmem:[%s565_s2 + $0x8] sm:$0xff]  ;;  %v120_v3 = vld [vmem:[%s564_s1] sm:$0xff]  ;;  %vm100_vm0 = vcmask 261120   ;;  %v159_v30 = vlaneseq }
  0x11   :  { %316 = vset.pattern.permute.xlu0 %v457_v1  ;;  %317 = vset.pattern.permute.xlu1 %v457_v1  ;;  %v148_v4 = vld [vmem:[#allocation3] sm:$0x1]  ;;  %v301_v5 = vld [vmem:[%s565_s2] sm:$0xff]  ;;  %v300_v6 = vld [vmem:[#allocation4] sm:$0xff]  ;;  %vm171_vm1 = vcmask 257024   ;;  %s241_s16 = sshll.u32 %s572_s9, 4  ;;  %s242_s16 = int_to_ptr.hbm [resolvable:$true] %s241_s16 }
  0x12   :  { %110 = vmatpush.bf16.msra.mxu0 %v302_v2  ;;  %124 = vperm.xlu0 %316, %v120_v3   ;;  %v121_v7 = vld [vmem:[%s564_s1 + $0x8] sm:$0xff]  ;;  %v305_v8 = vld [vmem:[#allocation7 + $0x8] sm:$0xff]  ;;  %v304_v9 = vld [vmem:[#allocation7] sm:$0xff]  ;;  %v160_v33 = vand.u32 127, %v159_v30  ;;  %s458_s1 = smov [#allocation10]   ;;  %vm164_vm2 = vcmask 130112  }
  0x13   :  { %151 = vperm.xlu1 %317, %v148_v4   ;;  %211 = vmatpush.bf16.msra.mxu1 %v305_v8  ;;  %v318_v10 = vld [vmem:[%s566_s3] ss:$0 sm:$0xff]  ;;  %s239_s3 = sshll.u32 %s458_s1, 4  ;;  %s459_s17 = smov [#allocation12]   ;;  %vm167_vm3 = vcmask 122880   ;;  %s240_s3 = int_to_ptr.vmem [resolvable:$true] %s239_s3 }
  0x14   :  { %v319_v15 = vld [vmem:[%s569_s6] ss:$0 sm:$0xff]  ;;  %v162_v35 = vadd.s32 4294967288, %v160_v33  ;;  %s249_s18 = sshll.u32 %s459_s17, 4  ;;  %s251_s21 = sshll.u32 %s573_s10, 4  ;;  %s250_s18 = int_to_ptr.vmem [resolvable:$true] %s249_s18  ;;  %s252_s21 = int_to_ptr.hbm [resolvable:$true] %s251_s21 }
  0x15   :  { %s460_s22 = smov 128   ;;  %s461_s9 = smov 8   ;;  %v320_v41 = vld [vmem:[%s568_s5] ss:$0 sm:$0xff] }
  0x16   :  { %111 = vmatpush.bf16.msra.mxu0 %v301_v5  ;;  %s462_s10 = smov [#allocation9]   ;;  %s227_s26 = sshll.u32 %s571_s8, 4  ;;  %s228_s26 = int_to_ptr.hbm [resolvable:$true] %s227_s26 }
  0x17   :  { %212 = vmatpush.bf16.msra.mxu1 %v304_v9  ;;  %s225_s7 = sshll.u32 %s462_s10, 4  ;;  %s226_s7 = int_to_ptr.vmem [resolvable:$true] %s225_s7 }
  0x19   :  { %286 = vmatmul.msk.bf16.vlgmr.msra.gmra.mxu0 %vm100_vm0, %v300_v6 }
  0x1a   :  { %129 = vperm.xlu0 %316, %v121_v7  }
  0x84   :  { %v125_v13 = vpop.permute.xlu0 %124 }
  0x85   :  { %v152_v29 = vpop.permute.xlu1 %151 }
  0x86   :  { %v154_v32 = vperm.slane %v152_v29, 0 }
  0x8c   :  { %v130_v23 = vpop.permute.xlu0 %129 }
  0x96   :  { %v113_v11 = vpop.f32.mrf.mxu0 }
  0x97   :  { %v114_v12 = vadd.f32 %v318_v10, %v113_v11 }
  0x99   :  { %321 = vtanh.f32 %v114_v12 }
  0x9e   :  { %v115_v14 = vpop.f32.mrf.mxu0 }
  0x9f   :  { %v322_v16 = vpop.eup %321  ;;  %v116_v17 = vadd.f32 %v318_v10, %v115_v14 }
  0xa0   :  { %v132_v18 = vmul.f32 %v322_v16, %v125_v13 }
  0xa1   :  { %323 = vtanh.f32 %v116_v17 }
  0xa2   :  { %134 = vst.msk [vmem:[#allocation12] sm:$0xff] %vm100_vm0, %v132_v18  ;;  %v169_v19 = vpack.c.bf16 %v132_v18, %v132_v18  ;;  %v140_v20 = vmul.f32 %v319_v15, %v132_v18 }
  0xa4   :  { %172 = vst.msk [vmem:[#allocation2] sm:$0xf] %vm171_vm1, %v169_v19  ;;  %v142_v21 = vsel %vm100_vm0, %v140_v20, 0.0 }
  0xa5   :  { %143 = vadd.xlane.f32.xlu1 %v142_v21 }
  0xa7   :  { %v324_v22 = vpop.eup %323 }
  0xa8   :  { %v133_v24 = vmul.f32 %v324_v22, %v130_v23 }
  0xaa   :  { %135 = vst.msk [vmem:[#allocation12 + $0x8] sm:$0xff] %vm100_vm0, %v133_v24  ;;  %v170_v25 = vpack.c.bf16 %v133_v24, %v133_v24  ;;  %v141_v26 = vmul.f32 %v319_v15, %v133_v24 }
  0xac   :  { %173 = vst.msk [vmem:[#allocation2 + $0x4] sm:$0xf] %vm171_vm1, %v170_v25  ;;  %v145_v27 = vsel %vm100_vm0, %v141_v26, 0.0 }
  0xad   :  { %146 = vadd.xlane.f32.xlu2 %v145_v27 }
  0xb3   :  { %v303_v28 = vld [vmem:[#allocation2] sm:$0xff] }
  0xb4   :  { %299 = vmatmul.msk.bf16.vlgmr.msra.gmra.mxu1 %vm100_vm0, %v303_v28 }
 0x118   :  { %v144_v31 = vpop.xlane.xlu1 %143 }
 0x119   :  { %v155_v34 = vadd.f32 %v154_v32, %v144_v31 }
 0x11b   :  { %v161_v38 = vperm.slane %v155_v34, %v160_v33 }
 0x120   :  { %v147_v36 = vpop.xlane.xlu2 %146 }
 0x121   :  { %v156_v37 = vadd.f32 %v154_v32, %v147_v36 }
 0x123   :  { %v163_v39 = vperm.slane %v156_v37, %v162_v35 }
 0x125   :  { %v165_v40 = vsel %vm164_vm2, %v163_v39, %v161_v38 }
 0x126   :  { %168 = vst.msk [vmem:[#allocation10] sm:$0x1] %vm167_vm3, %v165_v40 }
 0x127   :  { %244 = dma.vmem_to_hbm [thread:$0]  %s240_s3, 16, %s242_s16, [#allocation11]  }
 0x128   :  { %257 = dma.vmem_to_hbm [thread:$0]  %s250_s18, 256, %s252_s21, [#allocation11], %s460_s22, %s460_s22, %s461_s9  }
 0x131   :  { %v214_v42 = vpop.f32.mrf.mxu1 }
 0x132   :  { %v215_v43 = vadd.f32 %v320_v41, %v214_v42 }
 0x134   :  { %219 = vst [vmem:[#allocation9] sm:$0xff] %v215_v43 }
 0x139   :  { %v216_v44 = vpop.f32.mrf.mxu1 }
 0x13a   :  { %v217_v45 = vadd.f32 %v320_v41, %v216_v44 }
 0x13c   :  { %220 = vst [vmem:[#allocation9 + $0x8] sm:$0xff] %v217_v45 }
 0x13d   :  { %233 = dma.vmem_to_hbm [thread:$0]  %s226_s7, 256, %s228_s26, [#allocation6], %s460_s22, %s460_s22, %s461_s9  }
 0x13e   :  { %449 = dma.done.wait [#allocation6], 256  }
 0x13f   :  { %450 = vsyncadd [#allocation6], 4294967040 }
 0x140   :  { %451 = dma.done.wait [#allocation11], 272  }
 0x141   :  { %452 = vsyncadd [#allocation11], 4294967024 }
 0x142   :  { %270 = vsyncpa [#allocation5], 1 }
 0x143   :  { %271 = vsyncpa [#allocation8], 1 }
 0x144   :  { %272 = vsyncpa [#allocation6], 1 }
 0x145   :  { %273 = vsyncpa [#allocation11], 1 }

// kernel: tpu_custom_call.1
= control target key start
LH: loop header
LB: loop body
LE: loop exit
PB: predicated region body
PF: predicated region fallthrough
CT: control target
= control target key end

     0   :  { %s563_s0 = inlined_call_operand.hbm [shape: bf16[16,32], index: 0, kind: input, shape index: {}]   ;;  %s564_s1 = inlined_call_operand.vmem [shape: f32[16,1], index: 1, kind: input, shape index: {}]   ;;  %s565_s2 = inlined_call_operand.vmem [shape: bf16[32,32], index: 2, kind: input, shape index: {}]   ;;  %s566_s3 = inlined_call_operand.vmem [shape: f32[1,32], index: 3, kind: input, shape index: {}]   ;;  %s567_s4 = inlined_call_operand.hbm [shape: bf16[32,128], index: 4, kind: input, shape index: {}]   ;;  %s568_s5 = inlined_call_operand.vmem [shape: f32[1,128], index: 5, kind: input, shape index: {}]   ;;  %s569_s6 = inlined_call_operand.vmem [shape: f32[1,32], index: 6, kind: input, shape index: {}]   ;;  %s570_s7 = inlined_call_operand.<no memory space> [shape: f32[1,1], index: 7, kind: input, shape index: {}]   ;;  %s571_s8 = inlined_call_operand.hbm [shape: f32[16,128], index: 8, kind: output, shape index: {0}]   ;;  %s572_s9 = inlined_call_operand.hbm [shape: f32[1,16], index: 9, kind: output, shape index: {1}]   ;;  %s573_s10 = inlined_call_operand.hbm [shape: f32[16,32], index: 10, kind: output, shape index: {2}]  }
   0x1   :  { %v16_v0 = vstv %s570_s7 }
   0x2   :  { %17 = vst [vmem:[#allocation3] sm:$0x1] %v16_v0 }
   0x3   :  { %18 = vsyncpa [#allocation5], 0 }
   0x4   :  { %19 = vsyncpa [#allocation8], 0 }
   0x5   :  { %20 = vsyncpa [#allocation6], 0 }
   0x6   :  { %21 = vsyncpa [#allocation11], 0  ;;  %s26_s17 = sshll.u32 %s563_s0, 4  ;;  %s453_s18 = smov [#allocation4]   ;;  %s27_s17 = int_to_ptr.hbm [resolvable:$true] %s26_s17 }
   0x7   :  { %s28_s19 = sshll.u32 %s453_s18, 4  ;;  %s45_s22 = sshll.u32 %s567_s4, 4  ;;  %s29_s19 = int_to_ptr.vmem [resolvable:$true] %s28_s19  ;;  %s46_s22 = int_to_ptr.hbm [resolvable:$true] %s45_s22 }
   0x8   :  { %s454_s23 = smov 64   ;;  %s455_s24 = smov 4  }
   0x9   :  { %34 = dma.hbm_to_vmem [thread:$0]  %s27_s17, 128, %s29_s19, [#allocation5], %s454_s23, %s454_s23, %s455_s24  }
   0xa   :  { %s456_s7 = smov [#allocation7]  }
   0xb   :  { %s47_s25 = sshll.u32 %s456_s7, 4  ;;  %s48_s25 = int_to_ptr.vmem [resolvable:$true] %s47_s25 }
   0xc   :  { %53 = dma.hbm_to_vmem [thread:$0]  %s46_s22, 256, %s48_s25, [#allocation8], %s454_s23, %s454_s23, %s455_s24  }
   0xd   :  { %445 = dma.done.wait [#allocation5], 128  }
   0xe   :  { %446 = vsyncadd [#allocation5], 4294967168 }
   0xf   :  { %447 = dma.done.wait [#allocation8], 256  }
  0x10   :  { %448 = vsyncadd [#allocation8], 4294967040  ;;  %v457_v1 = vmov 0   ;;  %v302_v2 = vld [vmem:[%s565_s2 + $0x8] sm:$0xff]  ;;  %v120_v3 = vld [vmem:[%s564_s1] sm:$0xff]  ;;  %vm100_vm0 = vcmask 261120   ;;  %v159_v30 = vlaneseq }
  0x11   :  { %316 = vset.pattern.permute.xlu0 %v457_v1  ;;  %317 = vset.pattern.permute.xlu1 %v457_v1  ;;  %v148_v4 = vld [vmem:[#allocation3] sm:$0x1]  ;;  %v301_v5 = vld [vmem:[%s565_s2] sm:$0xff]  ;;  %v300_v6 = vld [vmem:[#allocation4] sm:$0xff]  ;;  %vm171_vm1 = vcmask 257024   ;;  %s241_s16 = sshll.u32 %s572_s9, 4  ;;  %s242_s16 = int_to_ptr.hbm [resolvable:$true] %s241_s16 }
  0x12   :  { %110 = vmatpush.bf16.msra.mxu0 %v302_v2  ;;  %124 = vperm.xlu0 %316, %v120_v3   ;;  %v121_v7 = vld [vmem:[%s564_s1 + $0x8] sm:$0xff]  ;;  %v305_v8 = vld [vmem:[#allocation7 + $0x8] sm:$0xff]  ;;  %v304_v9 = vld [vmem:[#allocation7] sm:$0xff]  ;;  %v160_v33 = vand.u32 127, %v159_v30  ;;  %s458_s1 = smov [#allocation10]   ;;  %vm164_vm2 = vcmask 130112  }
  0x13   :  { %151 = vperm.xlu1 %317, %v148_v4   ;;  %211 = vmatpush.bf16.msra.mxu1 %v305_v8  ;;  %v318_v10 = vld [vmem:[%s566_s3] ss:$0 sm:$0xff]  ;;  %s239_s3 = sshll.u32 %s458_s1, 4  ;;  %s459_s17 = smov [#allocation12]   ;;  %vm167_vm3 = vcmask 122880   ;;  %s240_s3 = int_to_ptr.vmem [resolvable:$true] %s239_s3 }
  0x14   :  { %v319_v15 = vld [vmem:[%s569_s6] ss:$0 sm:$0xff]  ;;  %v162_v35 = vadd.s32 4294967288, %v160_v33  ;;  %s249_s18 = sshll.u32 %s459_s17, 4  ;;  %s251_s21 = sshll.u32 %s573_s10, 4  ;;  %s250_s18 = int_to_ptr.vmem [resolvable:$true] %s249_s18  ;;  %s252_s21 = int_to_ptr.hbm [resolvable:$true] %s251_s21 }
  0x15   :  { %s460_s22 = smov 128   ;;  %s461_s9 = smov 8   ;;  %v320_v41 = vld [vmem:[%s568_s5] ss:$0 sm:$0xff] }
  0x16   :  { %111 = vmatpush.bf16.msra.mxu0 %v301_v5  ;;  %s462_s10 = smov [#allocation9]   ;;  %s227_s26 = sshll.u32 %s571_s8, 4  ;;  %s228_s26 = int_to_ptr.hbm [resolvable:$true] %s227_s26 }
  0x17   :  { %212 = vmatpush.bf16.msra.mxu1 %v304_v9  ;;  %s225_s7 = sshll.u32 %s462_s10, 4  ;;  %s226_s7 = int_to_ptr.vmem [resolvable:$true] %s225_s7 }
  0x19   :  { %286 = vmatmul.msk.bf16.vlgmr.msra.gmra.mxu0 %vm100_vm0, %v300_v6 }
  0x1a   :  { %129 = vperm.xlu0 %316, %v121_v7  }
  0x84   :  { %v125_v13 = vpop.permute.xlu0 %124 }
  0x85   :  { %v152_v29 = vpop.permute.xlu1 %151 }
  0x86   :  { %v154_v32 = vperm.slane %v152_v29, 0 }
  0x8c   :  { %v130_v23 = vpop.permute.xlu0 %129 }
  0x96   :  { %v113_v11 = vpop.f32.mrf.mxu0 }
  0x97   :  { %v114_v12 = vadd.f32 %v318_v10, %v113_v11 }
  0x99   :  { %321 = vtanh.f32 %v114_v12 }
  0x9e   :  { %v115_v14 = vpop.f32.mrf.mxu0 }
  0x9f   :  { %v322_v16 = vpop.eup %321  ;;  %v116_v17 = vadd.f32 %v318_v10, %v115_v14 }
  0xa0   :  { %v132_v18 = vmul.f32 %v322_v16, %v125_v13 }
  0xa1   :  { %323 = vtanh.f32 %v116_v17 }
  0xa2   :  { %134 = vst.msk [vmem:[#allocation12] sm:$0xff] %vm100_vm0, %v132_v18  ;;  %v169_v19 = vpack.c.bf16 %v132_v18, %v132_v18  ;;  %v140_v20 = vmul.f32 %v319_v15, %v132_v18 }
  0xa4   :  { %172 = vst.msk [vmem:[#allocation2] sm:$0xf] %vm171_vm1, %v169_v19  ;;  %v142_v21 = vsel %vm100_vm0, %v140_v20, 0.0 }
  0xa5   :  { %143 = vadd.xlane.f32.xlu1 %v142_v21 }
  0xa7   :  { %v324_v22 = vpop.eup %323 }
  0xa8   :  { %v133_v24 = vmul.f32 %v324_v22, %v130_v23 }
  0xaa   :  { %135 = vst.msk [vmem:[#allocation12 + $0x8] sm:$0xff] %vm100_vm0, %v133_v24  ;;  %v170_v25 = vpack.c.bf16 %v133_v24, %v133_v24  ;;  %v141_v26 = vmul.f32 %v319_v15, %v133_v24 }
  0xac   :  { %173 = vst.msk [vmem:[#allocation2 + $0x4] sm:$0xf] %vm171_vm1, %v170_v25  ;;  %v145_v27 = vsel %vm100_vm0, %v141_v26, 0.0 }
  0xad   :  { %146 = vadd.xlane.f32.xlu2 %v145_v27 }
  0xb3   :  { %v303_v28 = vld [vmem:[#allocation2] sm:$0xff] }
  0xb4   :  { %299 = vmatmul.msk.bf16.vlgmr.msra.gmra.mxu1 %vm100_vm0, %v303_v28 }
 0x118   :  { %v144_v31 = vpop.xlane.xlu1 %143 }
 0x119   :  { %v155_v34 = vadd.f32 %v154_v32, %v144_v31 }
 0x11b   :  { %v161_v38 = vperm.slane %v155_v34, %v160_v33 }
 0x120   :  { %v147_v36 = vpop.xlane.xlu2 %146 }
 0x121   :  { %v156_v37 = vadd.f32 %v154_v32, %v147_v36 }
 0x123   :  { %v163_v39 = vperm.slane %v156_v37, %v162_v35 }
 0x125   :  { %v165_v40 = vsel %vm164_vm2, %v163_v39, %v161_v38 }
 0x126   :  { %168 = vst.msk [vmem:[#allocation10] sm:$0x1] %vm167_vm3, %v165_v40 }
 0x127   :  { %244 = dma.vmem_to_hbm [thread:$0]  %s240_s3, 16, %s242_s16, [#allocation11]  }
 0x128   :  { %257 = dma.vmem_to_hbm [thread:$0]  %s250_s18, 256, %s252_s21, [#allocation11], %s460_s22, %s460_s22, %s461_s9  }
 0x131   :  { %v214_v42 = vpop.f32.mrf.mxu1 }
 0x132   :  { %v215_v43 = vadd.f32 %v320_v41, %v214_v42 }
 0x134   :  { %219 = vst [vmem:[#allocation9] sm:$0xff] %v215_v43 }
 0x139   :  { %v216_v44 = vpop.f32.mrf.mxu1 }
 0x13a   :  { %v217_v45 = vadd.f32 %v320_v41, %v216_v44 }
 0x13c   :  { %220 = vst [vmem:[#allocation9 + $0x8] sm:$0xff] %v217_v45 }
 0x13d   :  { %233 = dma.vmem_to_hbm [thread:$0]  %s226_s7, 256, %s228_s26, [#allocation6], %s460_s22, %s460_s22, %s461_s9  }
 0x13e   :  { %449 = dma.done.wait [#allocation6], 256  }
 0x13f   :  { %450 = vsyncadd [#allocation6], 4294967040 }
 0x140   :  { %451 = dma.done.wait [#allocation11], 272  }
 0x141   :  { %452 = vsyncadd [#allocation11], 4294967024 }
 0x142   :  { %270 = vsyncpa [#allocation5], 1 }
 0x143   :  { %271 = vsyncpa [#allocation8], 1 }
 0x144   :  { %272 = vsyncpa [#allocation6], 1 }
 0x145   :  { %273 = vsyncpa [#allocation11], 1 }

</bundles_post_ra>
